<compile_context>
chip_gen: v5e
topology: v5e:2x2
jax: 0.10.0
libtpu: 0.0.40
codegen_flags: <defaults>
</compile_context>

<pallas_src>
import jax
import jax.numpy as jnp
from jax.experimental import pallas as pl
from jax.experimental.pallas import tpu as pltpu

KSIZE = 7
DILATIONS = (1, 3, 9)
_DS_BLOCK = 128          # output columns handled per downsample block


def _elu(x):
    # exp is clamped so the untaken branch never overflows.
    return jnp.where(x > 0, x, jnp.exp(jnp.minimum(x, 0.0)) - 1.0)


def _derived(padding, stride, ch, L, lout):
    """Static geometry shared by the kernel factory and the wrapper."""
    same = padding == "same"
    half_k = KSIZE // 2
    g = dict(
        same=same,
        half_k=half_k,
        ch_pad=((ch + 7) // 8) * 8,                   # sublane-aligned tap row block
        maxpad=max(half_k * max(DILATIONS), stride) if same else 0,
        kf=2 * stride,
        pad_f=stride if same else 0,
        l_res_alloc=L if same else L - (KSIZE - 1) * DILATIONS[0],
        n_full=lout // _DS_BLOCK,
        tail=lout % _DS_BLOCK,
    )
    g["width_full"] = (_DS_BLOCK - 1) * stride + 1
    g["width_tail"] = (g["tail"] - 1) * stride + 1 if g["tail"] else 0
    g["width_ds"] = max(g["width_full"] if g["n_full"] else 0, g["width_tail"])
    g["stage_w"] = L + 2 * g["maxpad"]
    return g


def make_encoder_block_kernel(padding, stride, n_channels, L, lout,
                              compute_dtype):
    """Builds the Pallas kernel for a fixed (padding, stride, C, L) config."""
    ch = n_channels // 2
    g = _derived(padding, stride, ch, L, lout)
    same, half_k, ch_pad = g["same"], g["half_k"], g["ch_pad"]
    maxpad, kf, pad_f = g["maxpad"], g["kf"], g["pad_f"]
    n_full, tail = g["n_full"], g["tail"]
    width_full, width_tail = g["width_full"], g["width_tail"]
    base = maxpad - pad_f                 # stage column of padded position 0

    def kernel(x_ref, w0_ref, b0_ref, w1_ref, b1_ref, wd_ref, bd_ref, sel_ref,
               o_ref, stage, im2_res, im2_ds):
        # stage: (ch, L + 2*maxpad) compute_dtype staging buffer with zero
        # halos reused by every conv; im2_*: tap-stacked im2col buffers (rows
        # [t*ch_pad, t*ch_pad+ch) hold tap t).  Halos are re-zeroed every step:
        # cheap, and stays correct when the batch axis is megacore-sharded
        # (a program_id guard would only fire on one core).
        if maxpad > 0:
            stage[:, :maxpad] = jnp.zeros((ch, maxpad), compute_dtype)
            stage[:, maxpad + L:] = jnp.zeros((ch, maxpad), compute_dtype)
        if ch_pad != ch:
            # Padded sublane rows multiply zero weight columns; zero them so
            # stale NaN/Inf garbage cannot leak through 0 * garbage.
            im2_res[...] = jnp.zeros(im2_res.shape, im2_res.dtype)
            im2_ds[...] = jnp.zeros(im2_ds.shape, im2_ds.dtype)

        def dilated_conv(h, r, dilation):
            # h: (ch, l_in) f32 -> (ch, l_out) f32 via ONE folded MXU matmul
            # with contraction depth KSIZE * ch_pad.
            l_in = h.shape[1]
            pad = half_k * dilation if same else 0
            l_out = l_in + 2 * pad - dilation * (KSIZE - 1)
            stage[:, maxpad:maxpad + l_in] = h.astype(compute_dtype)
            for t in range(KSIZE):                       # im2col staging
                start = maxpad - pad + t * dilation
                im2_res[t * ch_pad:t * ch_pad + ch, :l_out] = (
                    stage[:, start:start + l_out])
            acc = jnp.dot(w0_ref[r], im2_res[:, :l_out],
                          preferred_element_type=jnp.float32)
            return acc + b0_ref[r]

        def resnet1d(h, r, dilation):
            trim = half_k * dilation
            z = _elu(dilated_conv(h, r, dilation))
            z = jnp.dot(w1_ref[r], z.astype(compute_dtype),
                        preferred_element_type=jnp.float32) + b1_ref[r]
            y = h if same else h[:, trim:h.shape[1] - trim]
            return _elu(z + y)

        h = x_ref[...].astype(jnp.float32)
        for r, d in enumerate(DILATIONS):
            h = resnet1d(h, r, d)

        # Final conv: kernel=2*stride, stride=stride, padding=stride|0, + ELU.
        l_h = h.shape[1]
        stage[:, maxpad:maxpad + l_h] = h.astype(compute_dtype)
        wd = wd_ref[...]                                 # (2ch, kf*ch_pad)
        bd = bd_ref[...]                                 # (2ch, 1)

        # --- full 128-column output blocks: dynamic, fori_loop ---
        if n_full > 0:
            win_w = base + (kf - 1) + width_full
            sel_f = sel_ref[...]                         # (width_full, 128)

            def body(j, carry):
                o_lo = pl.multiple_of(j * _DS_BLOCK, _DS_BLOCK)
                a_lo = pl.multiple_of(j * (_DS_BLOCK * stride), _DS_BLOCK)
                # Lane-aligned dynamic window read; per-tap shifts are static.
                win = stage[:, pl.ds(a_lo, win_w)]
                for t in range(kf):
                    im2_ds[t * ch_pad:t * ch_pad + ch, :width_full] = (
                        win[:, base + t:base + t + width_full])
                acc = jnp.dot(wd, im2_ds[:, :width_full],
                              preferred_element_type=jnp.float32)
                blk = jnp.dot(acc.astype(compute_dtype), sel_f,
                              preferred_element_type=jnp.float32)
                o_ref[:, pl.ds(o_lo, _DS_BLOCK)] = (
                    _elu(blk + bd).astype(o_ref.dtype))
                return carry

            jax.lax.fori_loop(0, n_full, body, 0)

        # --- ragged tail block: static slices ---
        if tail > 0:
            o_lo = n_full * _DS_BLOCK
            a_lo = o_lo * stride
            for t in range(kf):
                start = base + a_lo + t
                im2_ds[t * ch_pad:t * ch_pad + ch, :width_tail] = (
                    stage[:, start:start + width_tail])
            acc = jnp.dot(wd, im2_ds[:, :width_tail],
                          preferred_element_type=jnp.float32)
            sel_t = sel_ref[:width_tail, :tail]
            blk = jnp.dot(acc.astype(compute_dtype), sel_t,
                          preferred_element_type=jnp.float32)
            o_ref[:, o_lo:o_lo + tail] = _elu(blk + bd).astype(o_ref.dtype)

    return kernel, g


def _output_length(L, padding, stride):
    if padding == "valid":
        for d in DILATIONS:
            L = L - (KSIZE - 1) * d
        return (L - 2 * stride) // stride + 1
    return L // stride + 1


def _fold_conv_weight(w, ch_pad, compute_dtype):
    # (C_out, C_in, K) -> (C_out, K * ch_pad), tap-major, zero-padded per tap
    # so im2col tap blocks start on an 8-sublane boundary.
    c_out, c_in, k = w.shape
    wt = jnp.transpose(w, (0, 2, 1))                     # (C_out, K, C_in)
    if ch_pad != c_in:
        wt = jnp.pad(wt, ((0, 0), (0, 0), (0, ch_pad - c_in)))
    return wt.reshape(c_out, k * ch_pad).astype(compute_dtype)


def _vmem_limit_bytes(working_set_bytes):
    # Per-generation scoped-VMEM budget: ~80% of physical capacity
    # (~102 MiB on v5e/v6e's 128 MiB, ~51 MiB on v7x's 64 MiB) so Mosaic keeps
    # headroom for internal scratch and block double-buffers.
    cap = 128 * 1024 * 1024
    try:
        info = pltpu.get_tpu_info()
        for name in ("vmem_capacity_bytes", "vmem_size_bytes", "vmem_bytes"):
            v = getattr(info, name, None)
            if v:
                cap = int(v)
                break
    except Exception:
        pass
    ceiling = (cap * 4) // 5
    return int(min(ceiling, max(32 * 1024 * 1024, 2 * working_set_bytes)))


def encoder_block_forward(x, params, padding, stride,
                          compute_dtype=jnp.float32, out_dtype=None):
    B, ch, L = x.shape
    n_channels = 2 * ch
    lout = _output_length(L, padding, stride)
    out_dtype = jnp.dtype(out_dtype or jnp.float32)

    kernel, g = make_encoder_block_kernel(
        padding, stride, n_channels, L, lout, compute_dtype)
    ch_pad, kf = g["ch_pad"], g["kf"]

    # Folded, tap-major weights (one MXU contraction per conv); biases stay f32.
    w0 = jnp.stack([_fold_conv_weight(r[0], ch_pad, compute_dtype)
                    for r in params["resnets"]])          # (3, ch, K*ch_pad)
    b0 = jnp.stack([r[1] for r in params["resnets"]]).reshape(3, ch, 1)
    w1 = jnp.stack([r[2][:, :, 0] for r in params["resnets"]]
                   ).astype(compute_dtype)                # (3, ch, ch)
    b1 = jnp.stack([r[3] for r in params["resnets"]]).reshape(3, ch, 1)
    wd = _fold_conv_weight(params["wd"], ch_pad, compute_dtype)  # (2ch, kf*ch_pad)
    bd = params["bd"].reshape(n_channels, 1)

    # 0/1 decimation matrix for the strided conv, precomputed on host and run
    # through the MXU in compute_dtype (0 and 1 are exact in bf16).
    ob_sel = _DS_BLOCK if g["n_full"] else g["tail"]
    width_sel = (ob_sel - 1) * stride + 1
    sel = (jnp.arange(width_sel)[:, None] ==
           stride * jnp.arange(ob_sel)[None, :]).astype(compute_dtype)

    weights = [w0, b0, w1, b1, wd, bd, sel]

    in_specs = [pl.BlockSpec((None, ch, L), lambda b: (b, 0, 0))]
    for p in weights:
        in_specs.append(
            pl.BlockSpec(p.shape, lambda b, _n=p.ndim: (0,) * _n))
    out_specs = pl.BlockSpec((None, n_channels, lout), lambda b: (b, 0, 0))

    cbytes = jnp.dtype(compute_dtype).itemsize
    scratch_shapes = [
        pltpu.VMEM((ch, g["stage_w"]), compute_dtype),             # staging
        pltpu.VMEM((KSIZE * ch_pad, g["l_res_alloc"]), compute_dtype),  # im2col
        pltpu.VMEM((kf * ch_pad, g["width_ds"]), compute_dtype),   # im2col (ds)
    ]

    # Advisory cost estimate so XLA schedules around the custom call sensibly.
    flops = 0
    l_cur = L
    for d in DILATIONS:
        l_o = L if padding == "same" else l_cur - (KSIZE - 1) * d
        flops += 2 * ch * (KSIZE * ch) * l_o      # folded dilated conv
        flops += 2 * ch * ch * l_o                # 1x1 conv
        l_cur = l_o
    lc = l_cur + 2 * g["pad_f"] - kf + 1
    flops += 2 * n_channels * (kf * ch) * lc      # strided conv (stride-1 cols)
    flops += 2 * n_channels * (g["n_full"] * g["width_full"] * _DS_BLOCK
                               + g["width_tail"] * g["tail"])      # decimation
    flops *= B
    transcendentals = B * (2 * 3 * ch * L + n_channels * lout)
    weight_bytes = sum(int(p.size) * p.dtype.itemsize for p in weights)
    bytes_accessed = (x.size * x.dtype.itemsize + weight_bytes
                      + B * n_channels * lout * out_dtype.itemsize)
    cost = pl.CostEstimate(flops=int(flops),
                           transcendentals=int(transcendentals),
                           bytes_accessed=int(bytes_accessed))

    working = (
        ch * g["stage_w"] * cbytes
        + KSIZE * ch_pad * g["l_res_alloc"] * cbytes
        + kf * ch_pad * g["width_ds"] * cbytes
        + 2 * ch * L * x.dtype.itemsize                   # double-buffered input
        + 2 * n_channels * lout * out_dtype.itemsize      # double-buffered output
        + 2 * weight_bytes
        + 6 * ch * L * 4)                                 # live f32 temporaries
    vmem_limit = _vmem_limit_bytes(working)

    fn = pl.pallas_call(
        kernel,
        out_shape=jax.ShapeDtypeStruct((B, n_channels, lout), out_dtype),
        grid=(B,),
        in_specs=in_specs,
        out_specs=out_specs,
        scratch_shapes=scratch_shapes,
        compiler_params=pltpu.CompilerParams(
            dimension_semantics=("parallel",),
            vmem_limit_bytes=vmem_limit),
        cost_estimate=cost,
    )
    return fn(x, *weights)


# ----------------------------- pure-JAX reference -----------------------------

def _conv1d_ref(x, w, b, stride=1, dilation=1, pad=(0, 0)):
    out = jax.lax.conv_general_dilated(
        x, w, window_strides=(stride,), padding=[pad],
        rhs_dilation=(dilation,),
        dimension_numbers=("NCH", "OIH", "NCH"))
    return out + b[None, :, None]


def encoder_block_ref(x, params, padding, stride):
    elu = jax.nn.elu
    h = x
    for (w0, b0, w1, b1), d in zip(params["resnets"], DILATIONS):
        y = h
        if padding == "same":
            total = d * (KSIZE - 1)
            p = (total // 2, total - total // 2)
        else:
            p = (0, 0)
        t = _conv1d_ref(h, w0, b0, dilation=d, pad=p)
        t = elu(t)
        t = _conv1d_ref(t, w1, b1)
        if padding == "valid":
            trim = (KSIZE // 2) * d
            y = y[:, :, trim:-trim]
        h = elu(t + y)
    pf = stride if padding == "same" else 0
    h = _conv1d_ref(h, params["wd"], params["bd"], stride=stride, pad=(pf, pf))
    return elu(h)


# ------------------------------------ main ------------------------------------

def init_params(key, n_channels, stride):
    ch = n_channels // 2
    keys = jax.random.split(key, 14)
    ki = 0
    params = {"resnets": []}
    for _ in DILATIONS:
        w0 = jax.random.normal(keys[ki], (ch, ch, KSIZE), jnp.float32) * 0.3; ki += 1
        b0 = jax.random.normal(keys[ki], (ch,), jnp.float32) * 0.1; ki += 1
        w1 = jax.random.normal(keys[ki], (ch, ch, 1), jnp.float32) * 0.3; ki += 1
        b1 = jax.random.normal(keys[ki], (ch,), jnp.float32) * 0.1; ki += 1
        params["resnets"].append((w0, b0, w1, b1))
    params["wd"] = jax.random.normal(
        keys[ki], (n_channels, ch, 2 * stride), jnp.float32) * 0.3; ki += 1
    params["bd"] = jax.random.normal(keys[ki], (n_channels,), jnp.float32) * 0.1
    return params


if __name__ == "__main__":
    key = jax.random.PRNGKey(0)
    n_channels = 8      # EncoderBlock input has n_channels // 2 = 4 channels
    stride = 2
    kp, kx1, kx2, kx3 = jax.random.split(key, 4)
    params = init_params(kp, n_channels, stride)

    # 'same' padding, short sequence (single ragged downsample block).
    x_same = jax.random.normal(kx1, (2, n_channels // 2, 32), jnp.float32)
    out_same = jax.block_until_ready(
        encoder_block_forward(x_same, params, "same", stride))
    ref_same = encoder_block_ref(x_same, params, "same", stride)
    assert out_same.shape == ref_same.shape, (out_same.shape, ref_same.shape)
    assert jnp.allclose(out_same, ref_same, atol=1e-4, rtol=1e-4)

    # 'valid' padding (longer sequence so it survives the trims).
    x_valid = jax.random.normal(kx2, (2, n_channels // 2, 96), jnp.float32)
    out_valid = jax.block_until_ready(
        encoder_block_forward(x_valid, params, "valid", stride))
    ref_valid = encoder_block_ref(x_valid, params, "valid", stride)
    assert out_valid.shape == ref_valid.shape, (out_valid.shape, ref_valid.shape)
    assert jnp.allclose(out_valid, ref_valid, atol=1e-4, rtol=1e-4)

    # Longer 'same' sequence: exercises the fori_loop over full 128-column
    # downsample blocks (lane-aligned dynamic offsets) plus the ragged tail.
    x_long = jax.random.normal(kx3, (2, n_channels // 2, 640), jnp.float32)
    out_long = jax.block_until_ready(
        encoder_block_forward(x_long, params, "same", stride))
    ref_long = encoder_block_ref(x_long, params, "same", stride)
    assert out_long.shape == ref_long.shape, (out_long.shape, ref_long.shape)
    assert jnp.allclose(out_long, ref_long, atol=1e-4, rtol=1e-4)

    # bf16 MXU operands with f32 accumulation -- loose tolerance.
    out_bf16 = jax.block_until_ready(
        encoder_block_forward(x_same, params, "same", stride,
                              compute_dtype=jnp.bfloat16))
    assert out_bf16.shape == ref_same.shape
    max_err = float(jnp.max(jnp.abs(out_bf16 - ref_same)))
    assert max_err < 0.5, max_err

    print("KERNEL_OK")
</pallas_src>

<mosaic_0001>
module attributes {stable_mosaic.version = 11 : i64} {
  func.func @kernel(%arg0: i32, %arg1: memref<1x4x32xf32, #tpu.memory_space<vmem>>, %arg2: memref<3x4x56xf32, #tpu.memory_space<vmem>>, %arg3: memref<3x4x1xf32, #tpu.memory_space<vmem>>, %arg4: memref<3x4x4xf32, #tpu.memory_space<vmem>>, %arg5: memref<3x4x1xf32, #tpu.memory_space<vmem>>, %arg6: memref<8x32xf32, #tpu.memory_space<vmem>>, %arg7: memref<8x1xf32, #tpu.memory_space<vmem>>, %arg8: memref<33x17xf32, #tpu.memory_space<vmem>>, %arg9: memref<1x8x17xf32, #tpu.memory_space<vmem>>, %arg10: memref<4x86xf32, #tpu.memory_space<vmem>>, %arg11: memref<56x32xf32, #tpu.memory_space<vmem>>, %arg12: memref<32x33xf32, #tpu.memory_space<vmem>>) attributes {dimension_semantics = [#tpu.dimension_semantics<parallel>], iteration_bounds = array<i64: 2>, scalar_prefetch = 0 : i64, scratch_operands = 3 : i64, tpu.core_type = #tpu.core_type<tc>, window_params = [{transform_indices = @transform_0, window_bounds = array<i64: 1, 4, 32>}, {pipeline_mode = #tpu.pipeline_mode<synchronous>, transform_indices = @transform_1, window_bounds = array<i64: 3, 4, 56>}, {pipeline_mode = #tpu.pipeline_mode<synchronous>, transform_indices = @transform_2, window_bounds = array<i64: 3, 4, 1>}, {pipeline_mode = #tpu.pipeline_mode<synchronous>, transform_indices = @transform_3, window_bounds = array<i64: 3, 4, 4>}, {pipeline_mode = #tpu.pipeline_mode<synchronous>, transform_indices = @transform_4, window_bounds = array<i64: 3, 4, 1>}, {pipeline_mode = #tpu.pipeline_mode<synchronous>, transform_indices = @transform_5, window_bounds = array<i64: 8, 32>}, {pipeline_mode = #tpu.pipeline_mode<synchronous>, transform_indices = @transform_6, window_bounds = array<i64: 8, 1>}, {pipeline_mode = #tpu.pipeline_mode<synchronous>, transform_indices = @transform_7, window_bounds = array<i64: 33, 17>}, {transform_indices = @transform_8, window_bounds = array<i64: 1, 8, 17>}]} {
    %cst = arith.constant 0.000000e+00 : f32
    %0 = vector.broadcast %cst : f32 to vector<4x27xf32>
    %c0 = arith.constant 0 : index
    %c0_0 = arith.constant 0 : index
    %1 = vector.load %arg10[%c0, %c0_0] : memref<4x86xf32, #tpu.memory_space<vmem>>, vector<4x27xf32>
    tpu.vector_store %arg10[%c0, %c0_0], %0 {strides = array<i32>} : memref<4x86xf32, #tpu.memory_space<vmem>>, vector<4x27xf32>,
    %cst_1 = arith.constant 0.000000e+00 : f32
    %2 = vector.broadcast %cst_1 : f32 to vector<4x27xf32>
    %c0_2 = arith.constant 0 : index
    %c59 = arith.constant 59 : index
    %3 = vector.load %arg10[%c0_2, %c59] : memref<4x86xf32, #tpu.memory_space<vmem>>, vector<4x27xf32>
    tpu.vector_store %arg10[%c0_2, %c59], %2 {strides = array<i32>} : memref<4x86xf32, #tpu.memory_space<vmem>>, vector<4x27xf32>,
    %cst_3 = arith.constant 0.000000e+00 : f32
    %4 = vector.broadcast %cst_3 : f32 to vector<56x32xf32>
    %c0_4 = arith.constant 0 : index
    %c0_5 = arith.constant 0 : index
    %5 = vector.load %arg11[%c0_4, %c0_5] : memref<56x32xf32, #tpu.memory_space<vmem>>, vector<56x32xf32>
    tpu.vector_store %arg11[%c0_4, %c0_5], %4 {strides = array<i32>} : memref<56x32xf32, #tpu.memory_space<vmem>>, vector<56x32xf32>,
    %cst_6 = arith.constant 0.000000e+00 : f32
    %6 = vector.broadcast %cst_6 : f32 to vector<32x33xf32>
    %c0_7 = arith.constant 0 : index
    %c0_8 = arith.constant 0 : index
    %7 = vector.load %arg12[%c0_7, %c0_8] : memref<32x33xf32, #tpu.memory_space<vmem>>, vector<32x33xf32>
    tpu.vector_store %arg12[%c0_7, %c0_8], %6 {strides = array<i32>} : memref<32x33xf32, #tpu.memory_space<vmem>>, vector<32x33xf32>,
    %c0_9 = arith.constant 0 : index
    %c0_10 = arith.constant 0 : index
    %c0_11 = arith.constant 0 : index
    %8 = vector.load %arg1[%c0_9, %c0_10, %c0_11] : memref<1x4x32xf32, #tpu.memory_space<vmem>>, vector<1x4x32xf32>
    %9 = vector.shape_cast %8 : vector<1x4x32xf32> to vector<4x32xf32>
    %c0_12 = arith.constant 0 : index
    %c27 = arith.constant 27 : index
    %10 = vector.load %arg10[%c0_12, %c27] : memref<4x86xf32, #tpu.memory_space<vmem>>, vector<4x32xf32>
    tpu.vector_store %arg10[%c0_12, %c27], %9 {strides = array<i32>} : memref<4x86xf32, #tpu.memory_space<vmem>>, vector<4x32xf32>,
    %c0_13 = arith.constant 0 : index
    %c24 = arith.constant 24 : index
    %11 = vector.load %arg10[%c0_13, %c24] : memref<4x86xf32, #tpu.memory_space<vmem>>, vector<4x32xf32>
    %c0_14 = arith.constant 0 : index
    %c0_15 = arith.constant 0 : index
    %12 = vector.load %arg11[%c0_14, %c0_15] : memref<56x32xf32, #tpu.memory_space<vmem>>, vector<4x32xf32>
    tpu.vector_store %arg11[%c0_14, %c0_15], %11 {strides = array<i32>} : memref<56x32xf32, #tpu.memory_space<vmem>>, vector<4x32xf32>,
    %c0_16 = arith.constant 0 : index
    %c25 = arith.constant 25 : index
    %13 = vector.load %arg10[%c0_16, %c25] : memref<4x86xf32, #tpu.memory_space<vmem>>, vector<4x32xf32>
    %c8 = arith.constant 8 : index
    %c0_17 = arith.constant 0 : index
    %14 = vector.load %arg11[%c8, %c0_17] : memref<56x32xf32, #tpu.memory_space<vmem>>, vector<4x32xf32>
    tpu.vector_store %arg11[%c8, %c0_17], %13 {strides = array<i32>} : memref<56x32xf32, #tpu.memory_space<vmem>>, vector<4x32xf32>,
    %c0_18 = arith.constant 0 : index
    %c26 = arith.constant 26 : index
    %15 = vector.load %arg10[%c0_18, %c26] : memref<4x86xf32, #tpu.memory_space<vmem>>, vector<4x32xf32>
    %c16 = arith.constant 16 : index
    %c0_19 = arith.constant 0 : index
    %16 = vector.load %arg11[%c16, %c0_19] : memref<56x32xf32, #tpu.memory_space<vmem>>, vector<4x32xf32>
    tpu.vector_store %arg11[%c16, %c0_19], %15 {strides = array<i32>} : memref<56x32xf32, #tpu.memory_space<vmem>>, vector<4x32xf32>,
    %c0_20 = arith.constant 0 : index
    %c27_21 = arith.constant 27 : index
    %17 = vector.load %arg10[%c0_20, %c27_21] : memref<4x86xf32, #tpu.memory_space<vmem>>, vector<4x32xf32>
    %c24_22 = arith.constant 24 : index
    %c0_23 = arith.constant 0 : index
    %18 = vector.load %arg11[%c24_22, %c0_23] : memref<56x32xf32, #tpu.memory_space<vmem>>, vector<4x32xf32>
    tpu.vector_store %arg11[%c24_22, %c0_23], %17 {strides = array<i32>} : memref<56x32xf32, #tpu.memory_space<vmem>>, vector<4x32xf32>,
    %c0_24 = arith.constant 0 : index
    %c28 = arith.constant 28 : index
    %19 = vector.load %arg10[%c0_24, %c28] : memref<4x86xf32, #tpu.memory_space<vmem>>, vector<4x32xf32>
    %c32 = arith.constant 32 : index
    %c0_25 = arith.constant 0 : index
    %20 = vector.load %arg11[%c32, %c0_25] : memref<56x32xf32, #tpu.memory_space<vmem>>, vector<4x32xf32>
    tpu.vector_store %arg11[%c32, %c0_25], %19 {strides = array<i32>} : memref<56x32xf32, #tpu.memory_space<vmem>>, vector<4x32xf32>,
    %c0_26 = arith.constant 0 : index
    %c29 = arith.constant 29 : index
    %21 = vector.load %arg10[%c0_26, %c29] : memref<4x86xf32, #tpu.memory_space<vmem>>, vector<4x32xf32>
    %c40 = arith.constant 40 : index
    %c0_27 = arith.constant 0 : index
    %22 = vector.load %arg11[%c40, %c0_27] : memref<56x32xf32, #tpu.memory_space<vmem>>, vector<4x32xf32>
    tpu.vector_store %arg11[%c40, %c0_27], %21 {strides = array<i32>} : memref<56x32xf32, #tpu.memory_space<vmem>>, vector<4x32xf32>,
    %c0_28 = arith.constant 0 : index
    %c30 = arith.constant 30 : index
    %23 = vector.load %arg10[%c0_28, %c30] : memref<4x86xf32, #tpu.memory_space<vmem>>, vector<4x32xf32>
    %c48 = arith.constant 48 : index
    %c0_29 = arith.constant 0 : index
    %24 = vector.load %arg11[%c48, %c0_29] : memref<56x32xf32, #tpu.memory_space<vmem>>, vector<4x32xf32>
    tpu.vector_store %arg11[%c48, %c0_29], %23 {strides = array<i32>} : memref<56x32xf32, #tpu.memory_space<vmem>>, vector<4x32xf32>,
    %c0_30 = arith.constant 0 : index
    %c0_31 = arith.constant 0 : index
    %c0_32 = arith.constant 0 : index
    %25 = vector.load %arg2[%c0_30, %c0_31, %c0_32] : memref<3x4x56xf32, #tpu.memory_space<vmem>>, vector<1x4x56xf32>
    %26 = vector.shape_cast %25 : vector<1x4x56xf32> to vector<4x56xf32>
    %c0_33 = arith.constant 0 : index
    %c0_34 = arith.constant 0 : index
    %27 = vector.load %arg11[%c0_33, %c0_34] : memref<56x32xf32, #tpu.memory_space<vmem>>, vector<56x32xf32>
    %cst_35 = arith.constant dense<0.000000e+00> : vector<4x32xf32>
    %28 = tpu.matmul %26, %27, %cst_35 {dimension_numbers = #tpu.dot_dimension_numbers<[1], [0], [0], [1], [0, 0, 1, 1], [], []>} : vector<4x56xf32>, vector<56x32xf32>, vector<4x32xf32> -> vector<4x32xf32>
    %c0_36 = arith.constant 0 : index
    %c0_37 = arith.constant 0 : index
    %c0_38 = arith.constant 0 : index
    %29 = vector.load %arg3[%c0_36, %c0_37, %c0_38] : memref<3x4x1xf32, #tpu.memory_space<vmem>>, vector<1x4x1xf32>
    %30 = vector.shape_cast %29 : vector<1x4x1xf32> to vector<4x1xf32>
    %31 = vector.broadcast %30 : vector<4x1xf32> to vector<4x32xf32>
    %32 = arith.addf %28, %31 : vector<4x32xf32>
    %cst_39 = arith.constant 0.000000e+00 : f32
    %33 = vector.broadcast %cst_39 : f32 to vector<4x32xf32>
    %34 = arith.cmpf ogt, %32, %33 : vector<4x32xf32>
    %cst_40 = arith.constant 0.000000e+00 : f32
    %35 = vector.broadcast %cst_40 : f32 to vector<4x32xf32>
    %36 = arith.minimumf %32, %35 : vector<4x32xf32>
    %37 = math.exp %36 : vector<4x32xf32>
    %cst_41 = arith.constant 1.000000e+00 : f32
    %38 = vector.broadcast %cst_41 : f32 to vector<4x32xf32>
    %39 = arith.subf %37, %38 : vector<4x32xf32>
    %40 = arith.select %34, %32, %39 : vector<4x32xi1>, vector<4x32xf32>
    %c0_42 = arith.constant 0 : index
    %c0_43 = arith.constant 0 : index
    %c0_44 = arith.constant 0 : index
    %41 = vector.load %arg4[%c0_42, %c0_43, %c0_44] : memref<3x4x4xf32, #tpu.memory_space<vmem>>, vector<1x4x4xf32>
    %42 = vector.shape_cast %41 : vector<1x4x4xf32> to vector<4x4xf32>
    %cst_45 = arith.constant dense<0.000000e+00> : vector<4x32xf32>
    %43 = tpu.matmul %42, %40, %cst_45 {dimension_numbers = #tpu.dot_dimension_numbers<[1], [0], [0], [1], [0, 0, 1, 1], [], []>} : vector<4x4xf32>, vector<4x32xf32>, vector<4x32xf32> -> vector<4x32xf32>
    %c0_46 = arith.constant 0 : index
    %c0_47 = arith.constant 0 : index
    %c0_48 = arith.constant 0 : index
    %44 = vector.load %arg5[%c0_46, %c0_47, %c0_48] : memref<3x4x1xf32, #tpu.memory_space<vmem>>, vector<1x4x1xf32>
    %45 = vector.shape_cast %44 : vector<1x4x1xf32> to vector<4x1xf32>
    %46 = vector.broadcast %45 : vector<4x1xf32> to vector<4x32xf32>
    %47 = arith.addf %43, %46 : vector<4x32xf32>
    %48 = arith.addf %47, %9 : vector<4x32xf32>
    %cst_49 = arith.constant 0.000000e+00 : f32
    %49 = vector.broadcast %cst_49 : f32 to vector<4x32xf32>
    %50 = arith.cmpf ogt, %48, %49 : vector<4x32xf32>
    %cst_50 = arith.constant 0.000000e+00 : f32
    %51 = vector.broadcast %cst_50 : f32 to vector<4x32xf32>
    %52 = arith.minimumf %48, %51 : vector<4x32xf32>
    %53 = math.exp %52 : vector<4x32xf32>
    %cst_51 = arith.constant 1.000000e+00 : f32
    %54 = vector.broadcast %cst_51 : f32 to vector<4x32xf32>
    %55 = arith.subf %53, %54 : vector<4x32xf32>
    %56 = arith.select %50, %48, %55 : vector<4x32xi1>, vector<4x32xf32>
    %c0_52 = arith.constant 0 : index
    %c27_53 = arith.constant 27 : index
    %57 = vector.load %arg10[%c0_52, %c27_53] : memref<4x86xf32, #tpu.memory_space<vmem>>, vector<4x32xf32>
    tpu.vector_store %arg10[%c0_52, %c27_53], %56 {strides = array<i32>} : memref<4x86xf32, #tpu.memory_space<vmem>>, vector<4x32xf32>,
    %c0_54 = arith.constant 0 : index
    %c18 = arith.constant 18 : index
    %58 = vector.load %arg10[%c0_54, %c18] : memref<4x86xf32, #tpu.memory_space<vmem>>, vector<4x32xf32>
    %c0_55 = arith.constant 0 : index
    %c0_56 = arith.constant 0 : index
    %59 = vector.load %arg11[%c0_55, %c0_56] : memref<56x32xf32, #tpu.memory_space<vmem>>, vector<4x32xf32>
    tpu.vector_store %arg11[%c0_55, %c0_56], %58 {strides = array<i32>} : memref<56x32xf32, #tpu.memory_space<vmem>>, vector<4x32xf32>,
    %c0_57 = arith.constant 0 : index
    %c21 = arith.constant 21 : index
    %60 = vector.load %arg10[%c0_57, %c21] : memref<4x86xf32, #tpu.memory_space<vmem>>, vector<4x32xf32>
    %c8_58 = arith.constant 8 : index
    %c0_59 = arith.constant 0 : index
    %61 = vector.load %arg11[%c8_58, %c0_59] : memref<56x32xf32, #tpu.memory_space<vmem>>, vector<4x32xf32>
    tpu.vector_store %arg11[%c8_58, %c0_59], %60 {strides = array<i32>} : memref<56x32xf32, #tpu.memory_space<vmem>>, vector<4x32xf32>,
    %c0_60 = arith.constant 0 : index
    %c24_61 = arith.constant 24 : index
    %62 = vector.load %arg10[%c0_60, %c24_61] : memref<4x86xf32, #tpu.memory_space<vmem>>, vector<4x32xf32>
    %c16_62 = arith.constant 16 : index
    %c0_63 = arith.constant 0 : index
    %63 = vector.load %arg11[%c16_62, %c0_63] : memref<56x32xf32, #tpu.memory_space<vmem>>, vector<4x32xf32>
    tpu.vector_store %arg11[%c16_62, %c0_63], %62 {strides = array<i32>} : memref<56x32xf32, #tpu.memory_space<vmem>>, vector<4x32xf32>,
    %c0_64 = arith.constant 0 : index
    %c27_65 = arith.constant 27 : index
    %64 = vector.load %arg10[%c0_64, %c27_65] : memref<4x86xf32, #tpu.memory_space<vmem>>, vector<4x32xf32>
    %c24_66 = arith.constant 24 : index
    %c0_67 = arith.constant 0 : index
    %65 = vector.load %arg11[%c24_66, %c0_67] : memref<56x32xf32, #tpu.memory_space<vmem>>, vector<4x32xf32>
    tpu.vector_store %arg11[%c24_66, %c0_67], %64 {strides = array<i32>} : memref<56x32xf32, #tpu.memory_space<vmem>>, vector<4x32xf32>,
    %c0_68 = arith.constant 0 : index
    %c30_69 = arith.constant 30 : index
    %66 = vector.load %arg10[%c0_68, %c30_69] : memref<4x86xf32, #tpu.memory_space<vmem>>, vector<4x32xf32>
    %c32_70 = arith.constant 32 : index
    %c0_71 = arith.constant 0 : index
    %67 = vector.load %arg11[%c32_70, %c0_71] : memref<56x32xf32, #tpu.memory_space<vmem>>, vector<4x32xf32>
    tpu.vector_store %arg11[%c32_70, %c0_71], %66 {strides = array<i32>} : memref<56x32xf32, #tpu.memory_space<vmem>>, vector<4x32xf32>,
    %c0_72 = arith.constant 0 : index
    %c33 = arith.constant 33 : index
    %68 = vector.load %arg10[%c0_72, %c33] : memref<4x86xf32, #tpu.memory_space<vmem>>, vector<4x32xf32>
    %c40_73 = arith.constant 40 : index
    %c0_74 = arith.constant 0 : index
    %69 = vector.load %arg11[%c40_73, %c0_74] : memref<56x32xf32, #tpu.memory_space<vmem>>, vector<4x32xf32>
    tpu.vector_store %arg11[%c40_73, %c0_74], %68 {strides = array<i32>} : memref<56x32xf32, #tpu.memory_space<vmem>>, vector<4x32xf32>,
    %c0_75 = arith.constant 0 : index
    %c36 = arith.constant 36 : index
    %70 = vector.load %arg10[%c0_75, %c36] : memref<4x86xf32, #tpu.memory_space<vmem>>, vector<4x32xf32>
    %c48_76 = arith.constant 48 : index
    %c0_77 = arith.constant 0 : index
    %71 = vector.load %arg11[%c48_76, %c0_77] : memref<56x32xf32, #tpu.memory_space<vmem>>, vector<4x32xf32>
    tpu.vector_store %arg11[%c48_76, %c0_77], %70 {strides = array<i32>} : memref<56x32xf32, #tpu.memory_space<vmem>>, vector<4x32xf32>,
    %c1 = arith.constant 1 : index
    %c0_78 = arith.constant 0 : index
    %c0_79 = arith.constant 0 : index
    %72 = vector.load %arg2[%c1, %c0_78, %c0_79] : memref<3x4x56xf32, #tpu.memory_space<vmem>>, vector<1x4x56xf32>
    %73 = vector.shape_cast %72 : vector<1x4x56xf32> to vector<4x56xf32>
    %c0_80 = arith.constant 0 : index
    %c0_81 = arith.constant 0 : index
    %74 = vector.load %arg11[%c0_80, %c0_81] : memref<56x32xf32, #tpu.memory_space<vmem>>, vector<56x32xf32>
    %cst_82 = arith.constant dense<0.000000e+00> : vector<4x32xf32>
    %75 = tpu.matmul %73, %74, %cst_82 {dimension_numbers = #tpu.dot_dimension_numbers<[1], [0], [0], [1], [0, 0, 1, 1], [], []>} : vector<4x56xf32>, vector<56x32xf32>, vector<4x32xf32> -> vector<4x32xf32>
    %c1_83 = arith.constant 1 : index
    %c0_84 = arith.constant 0 : index
    %c0_85 = arith.constant 0 : index
    %76 = vector.load %arg3[%c1_83, %c0_84, %c0_85] : memref<3x4x1xf32, #tpu.memory_space<vmem>>, vector<1x4x1xf32>
    %77 = vector.shape_cast %76 : vector<1x4x1xf32> to vector<4x1xf32>
    %78 = vector.broadcast %77 : vector<4x1xf32> to vector<4x32xf32>
    %79 = arith.addf %75, %78 : vector<4x32xf32>
    %cst_86 = arith.constant 0.000000e+00 : f32
    %80 = vector.broadcast %cst_86 : f32 to vector<4x32xf32>
    %81 = arith.cmpf ogt, %79, %80 : vector<4x32xf32>
    %cst_87 = arith.constant 0.000000e+00 : f32
    %82 = vector.broadcast %cst_87 : f32 to vector<4x32xf32>
    %83 = arith.minimumf %79, %82 : vector<4x32xf32>
    %84 = math.exp %83 : vector<4x32xf32>
    %cst_88 = arith.constant 1.000000e+00 : f32
    %85 = vector.broadcast %cst_88 : f32 to vector<4x32xf32>
    %86 = arith.subf %84, %85 : vector<4x32xf32>
    %87 = arith.select %81, %79, %86 : vector<4x32xi1>, vector<4x32xf32>
    %c1_89 = arith.constant 1 : index
    %c0_90 = arith.constant 0 : index
    %c0_91 = arith.constant 0 : index
    %88 = vector.load %arg4[%c1_89, %c0_90, %c0_91] : memref<3x4x4xf32, #tpu.memory_space<vmem>>, vector<1x4x4xf32>
    %89 = vector.shape_cast %88 : vector<1x4x4xf32> to vector<4x4xf32>
    %cst_92 = arith.constant dense<0.000000e+00> : vector<4x32xf32>
    %90 = tpu.matmul %89, %87, %cst_92 {dimension_numbers = #tpu.dot_dimension_numbers<[1], [0], [0], [1], [0, 0, 1, 1], [], []>} : vector<4x4xf32>, vector<4x32xf32>, vector<4x32xf32> -> vector<4x32xf32>
    %c1_93 = arith.constant 1 : index
    %c0_94 = arith.constant 0 : index
    %c0_95 = arith.constant 0 : index
    %91 = vector.load %arg5[%c1_93, %c0_94, %c0_95] : memref<3x4x1xf32, #tpu.memory_space<vmem>>, vector<1x4x1xf32>
    %92 = vector.shape_cast %91 : vector<1x4x1xf32> to vector<4x1xf32>
    %93 = vector.broadcast %92 : vector<4x1xf32> to vector<4x32xf32>
    %94 = arith.addf %90, %93 : vector<4x32xf32>
    %95 = arith.addf %94, %56 : vector<4x32xf32>
    %cst_96 = arith.constant 0.000000e+00 : f32
    %96 = vector.broadcast %cst_96 : f32 to vector<4x32xf32>
    %97 = arith.cmpf ogt, %95, %96 : vector<4x32xf32>
    %cst_97 = arith.constant 0.000000e+00 : f32
    %98 = vector.broadcast %cst_97 : f32 to vector<4x32xf32>
    %99 = arith.minimumf %95, %98 : vector<4x32xf32>
    %100 = math.exp %99 : vector<4x32xf32>
    %cst_98 = arith.constant 1.000000e+00 : f32
    %101 = vector.broadcast %cst_98 : f32 to vector<4x32xf32>
    %102 = arith.subf %100, %101 : vector<4x32xf32>
    %103 = arith.select %97, %95, %102 : vector<4x32xi1>, vector<4x32xf32>
    %c0_99 = arith.constant 0 : index
    %c27_100 = arith.constant 27 : index
    %104 = vector.load %arg10[%c0_99, %c27_100] : memref<4x86xf32, #tpu.memory_space<vmem>>, vector<4x32xf32>
    tpu.vector_store %arg10[%c0_99, %c27_100], %103 {strides = array<i32>} : memref<4x86xf32, #tpu.memory_space<vmem>>, vector<4x32xf32>,
    %c0_101 = arith.constant 0 : index
    %c0_102 = arith.constant 0 : index
    %105 = vector.load %arg10[%c0_101, %c0_102] : memref<4x86xf32, #tpu.memory_space<vmem>>, vector<4x32xf32>
    %c0_103 = arith.constant 0 : index
    %c0_104 = arith.constant 0 : index
    %106 = vector.load %arg11[%c0_103, %c0_104] : memref<56x32xf32, #tpu.memory_space<vmem>>, vector<4x32xf32>
    tpu.vector_store %arg11[%c0_103, %c0_104], %105 {strides = array<i32>} : memref<56x32xf32, #tpu.memory_space<vmem>>, vector<4x32xf32>,
    %c0_105 = arith.constant 0 : index
    %c9 = arith.constant 9 : index
    %107 = vector.load %arg10[%c0_105, %c9] : memref<4x86xf32, #tpu.memory_space<vmem>>, vector<4x32xf32>
    %c8_106 = arith.constant 8 : index
    %c0_107 = arith.constant 0 : index
    %108 = vector.load %arg11[%c8_106, %c0_107] : memref<56x32xf32, #tpu.memory_space<vmem>>, vector<4x32xf32>
    tpu.vector_store %arg11[%c8_106, %c0_107], %107 {strides = array<i32>} : memref<56x32xf32, #tpu.memory_space<vmem>>, vector<4x32xf32>,
    %c0_108 = arith.constant 0 : index
    %c18_109 = arith.constant 18 : index
    %109 = vector.load %arg10[%c0_108, %c18_109] : memref<4x86xf32, #tpu.memory_space<vmem>>, vector<4x32xf32>
    %c16_110 = arith.constant 16 : index
    %c0_111 = arith.constant 0 : index
    %110 = vector.load %arg11[%c16_110, %c0_111] : memref<56x32xf32, #tpu.memory_space<vmem>>, vector<4x32xf32>
    tpu.vector_store %arg11[%c16_110, %c0_111], %109 {strides = array<i32>} : memref<56x32xf32, #tpu.memory_space<vmem>>, vector<4x32xf32>,
    %c0_112 = arith.constant 0 : index
    %c27_113 = arith.constant 27 : index
    %111 = vector.load %arg10[%c0_112, %c27_113] : memref<4x86xf32, #tpu.memory_space<vmem>>, vector<4x32xf32>
    %c24_114 = arith.constant 24 : index
    %c0_115 = arith.constant 0 : index
    %112 = vector.load %arg11[%c24_114, %c0_115] : memref<56x32xf32, #tpu.memory_space<vmem>>, vector<4x32xf32>
    tpu.vector_store %arg11[%c24_114, %c0_115], %111 {strides = array<i32>} : memref<56x32xf32, #tpu.memory_space<vmem>>, vector<4x32xf32>,
    %c0_116 = arith.constant 0 : index
    %c36_117 = arith.constant 36 : index
    %113 = vector.load %arg10[%c0_116, %c36_117] : memref<4x86xf32, #tpu.memory_space<vmem>>, vector<4x32xf32>
    %c32_118 = arith.constant 32 : index
    %c0_119 = arith.constant 0 : index
    %114 = vector.load %arg11[%c32_118, %c0_119] : memref<56x32xf32, #tpu.memory_space<vmem>>, vector<4x32xf32>
    tpu.vector_store %arg11[%c32_118, %c0_119], %113 {strides = array<i32>} : memref<56x32xf32, #tpu.memory_space<vmem>>, vector<4x32xf32>,
    %c0_120 = arith.constant 0 : index
    %c45 = arith.constant 45 : index
    %115 = vector.load %arg10[%c0_120, %c45] : memref<4x86xf32, #tpu.memory_space<vmem>>, vector<4x32xf32>
    %c40_121 = arith.constant 40 : index
    %c0_122 = arith.constant 0 : index
    %116 = vector.load %arg11[%c40_121, %c0_122] : memref<56x32xf32, #tpu.memory_space<vmem>>, vector<4x32xf32>
    tpu.vector_store %arg11[%c40_121, %c0_122], %115 {strides = array<i32>} : memref<56x32xf32, #tpu.memory_space<vmem>>, vector<4x32xf32>,
    %c0_123 = arith.constant 0 : index
    %c54 = arith.constant 54 : index
    %117 = vector.load %arg10[%c0_123, %c54] : memref<4x86xf32, #tpu.memory_space<vmem>>, vector<4x32xf32>
    %c48_124 = arith.constant 48 : index
    %c0_125 = arith.constant 0 : index
    %118 = vector.load %arg11[%c48_124, %c0_125] : memref<56x32xf32, #tpu.memory_space<vmem>>, vector<4x32xf32>
    tpu.vector_store %arg11[%c48_124, %c0_125], %117 {strides = array<i32>} : memref<56x32xf32, #tpu.memory_space<vmem>>, vector<4x32xf32>,
    %c2 = arith.constant 2 : index
    %c0_126 = arith.constant 0 : index
    %c0_127 = arith.constant 0 : index
    %119 = vector.load %arg2[%c2, %c0_126, %c0_127] : memref<3x4x56xf32, #tpu.memory_space<vmem>>, vector<1x4x56xf32>
    %120 = vector.shape_cast %119 : vector<1x4x56xf32> to vector<4x56xf32>
    %c0_128 = arith.constant 0 : index
    %c0_129 = arith.constant 0 : index
    %121 = vector.load %arg11[%c0_128, %c0_129] : memref<56x32xf32, #tpu.memory_space<vmem>>, vector<56x32xf32>
    %cst_130 = arith.constant dense<0.000000e+00> : vector<4x32xf32>
    %122 = tpu.matmul %120, %121, %cst_130 {dimension_numbers = #tpu.dot_dimension_numbers<[1], [0], [0], [1], [0, 0, 1, 1], [], []>} : vector<4x56xf32>, vector<56x32xf32>, vector<4x32xf32> -> vector<4x32xf32>
    %c2_131 = arith.constant 2 : index
    %c0_132 = arith.constant 0 : index
    %c0_133 = arith.constant 0 : index
    %123 = vector.load %arg3[%c2_131, %c0_132, %c0_133] : memref<3x4x1xf32, #tpu.memory_space<vmem>>, vector<1x4x1xf32>
    %124 = vector.shape_cast %123 : vector<1x4x1xf32> to vector<4x1xf32>
    %125 = vector.broadcast %124 : vector<4x1xf32> to vector<4x32xf32>
    %126 = arith.addf %122, %125 : vector<4x32xf32>
    %cst_134 = arith.constant 0.000000e+00 : f32
    %127 = vector.broadcast %cst_134 : f32 to vector<4x32xf32>
    %128 = arith.cmpf ogt, %126, %127 : vector<4x32xf32>
    %cst_135 = arith.constant 0.000000e+00 : f32
    %129 = vector.broadcast %cst_135 : f32 to vector<4x32xf32>
    %130 = arith.minimumf %126, %129 : vector<4x32xf32>
    %131 = math.exp %130 : vector<4x32xf32>
    %cst_136 = arith.constant 1.000000e+00 : f32
    %132 = vector.broadcast %cst_136 : f32 to vector<4x32xf32>
    %133 = arith.subf %131, %132 : vector<4x32xf32>
    %134 = arith.select %128, %126, %133 : vector<4x32xi1>, vector<4x32xf32>
    %c2_137 = arith.constant 2 : index
    %c0_138 = arith.constant 0 : index
    %c0_139 = arith.constant 0 : index
    %135 = vector.load %arg4[%c2_137, %c0_138, %c0_139] : memref<3x4x4xf32, #tpu.memory_space<vmem>>, vector<1x4x4xf32>
    %136 = vector.shape_cast %135 : vector<1x4x4xf32> to vector<4x4xf32>
    %cst_140 = arith.constant dense<0.000000e+00> : vector<4x32xf32>
    %137 = tpu.matmul %136, %134, %cst_140 {dimension_numbers = #tpu.dot_dimension_numbers<[1], [0], [0], [1], [0, 0, 1, 1], [], []>} : vector<4x4xf32>, vector<4x32xf32>, vector<4x32xf32> -> vector<4x32xf32>
    %c2_141 = arith.constant 2 : index
    %c0_142 = arith.constant 0 : index
    %c0_143 = arith.constant 0 : index
    %138 = vector.load %arg5[%c2_141, %c0_142, %c0_143] : memref<3x4x1xf32, #tpu.memory_space<vmem>>, vector<1x4x1xf32>
    %139 = vector.shape_cast %138 : vector<1x4x1xf32> to vector<4x1xf32>
    %140 = vector.broadcast %139 : vector<4x1xf32> to vector<4x32xf32>
    %141 = arith.addf %137, %140 : vector<4x32xf32>
    %142 = arith.addf %141, %103 : vector<4x32xf32>
    %cst_144 = arith.constant 0.000000e+00 : f32
    %143 = vector.broadcast %cst_144 : f32 to vector<4x32xf32>
    %144 = arith.cmpf ogt, %142, %143 : vector<4x32xf32>
    %cst_145 = arith.constant 0.000000e+00 : f32
    %145 = vector.broadcast %cst_145 : f32 to vector<4x32xf32>
    %146 = arith.minimumf %142, %145 : vector<4x32xf32>
    %147 = math.exp %146 : vector<4x32xf32>
    %cst_146 = arith.constant 1.000000e+00 : f32
    %148 = vector.broadcast %cst_146 : f32 to vector<4x32xf32>
    %149 = arith.subf %147, %148 : vector<4x32xf32>
    %150 = arith.select %144, %142, %149 : vector<4x32xi1>, vector<4x32xf32>
    %c0_147 = arith.constant 0 : index
    %c27_148 = arith.constant 27 : index
    %151 = vector.load %arg10[%c0_147, %c27_148] : memref<4x86xf32, #tpu.memory_space<vmem>>, vector<4x32xf32>
    tpu.vector_store %arg10[%c0_147, %c27_148], %150 {strides = array<i32>} : memref<4x86xf32, #tpu.memory_space<vmem>>, vector<4x32xf32>,
    %c0_149 = arith.constant 0 : index
    %c0_150 = arith.constant 0 : index
    %152 = vector.load %arg6[%c0_149, %c0_150] : memref<8x32xf32, #tpu.memory_space<vmem>>, vector<8x32xf32>
    %c0_151 = arith.constant 0 : index
    %c0_152 = arith.constant 0 : index
    %153 = vector.load %arg7[%c0_151, %c0_152] : memref<8x1xf32, #tpu.memory_space<vmem>>, vector<8x1xf32>
    %c0_153 = arith.constant 0 : index
    %c25_154 = arith.constant 25 : index
    %154 = vector.load %arg10[%c0_153, %c25_154] : memref<4x86xf32, #tpu.memory_space<vmem>>, vector<4x33xf32>
    %c0_155 = arith.constant 0 : index
    %c0_156 = arith.constant 0 : index
    %155 = vector.load %arg12[%c0_155, %c0_156] : memref<32x33xf32, #tpu.memory_space<vmem>>, vector<4x33xf32>
    tpu.vector_store %arg12[%c0_155, %c0_156], %154 {strides = array<i32>} : memref<32x33xf32, #tpu.memory_space<vmem>>, vector<4x33xf32>,
    %c0_157 = arith.constant 0 : index
    %c26_158 = arith.constant 26 : index
    %156 = vector.load %arg10[%c0_157, %c26_158] : memref<4x86xf32, #tpu.memory_space<vmem>>, vector<4x33xf32>
    %c8_159 = arith.constant 8 : index
    %c0_160 = arith.constant 0 : index
    %157 = vector.load %arg12[%c8_159, %c0_160] : memref<32x33xf32, #tpu.memory_space<vmem>>, vector<4x33xf32>
    tpu.vector_store %arg12[%c8_159, %c0_160], %156 {strides = array<i32>} : memref<32x33xf32, #tpu.memory_space<vmem>>, vector<4x33xf32>,
    %c0_161 = arith.constant 0 : index
    %c27_162 = arith.constant 27 : index
    %158 = vector.load %arg10[%c0_161, %c27_162] : memref<4x86xf32, #tpu.memory_space<vmem>>, vector<4x33xf32>
    %c16_163 = arith.constant 16 : index
    %c0_164 = arith.constant 0 : index
    %159 = vector.load %arg12[%c16_163, %c0_164] : memref<32x33xf32, #tpu.memory_space<vmem>>, vector<4x33xf32>
    tpu.vector_store %arg12[%c16_163, %c0_164], %158 {strides = array<i32>} : memref<32x33xf32, #tpu.memory_space<vmem>>, vector<4x33xf32>,
    %c0_165 = arith.constant 0 : index
    %c28_166 = arith.constant 28 : index
    %160 = vector.load %arg10[%c0_165, %c28_166] : memref<4x86xf32, #tpu.memory_space<vmem>>, vector<4x33xf32>
    %c24_167 = arith.constant 24 : index
    %c0_168 = arith.constant 0 : index
    %161 = vector.load %arg12[%c24_167, %c0_168] : memref<32x33xf32, #tpu.memory_space<vmem>>, vector<4x33xf32>
    tpu.vector_store %arg12[%c24_167, %c0_168], %160 {strides = array<i32>} : memref<32x33xf32, #tpu.memory_space<vmem>>, vector<4x33xf32>,
    %c0_169 = arith.constant 0 : index
    %c0_170 = arith.constant 0 : index
    %162 = vector.load %arg12[%c0_169, %c0_170] : memref<32x33xf32, #tpu.memory_space<vmem>>, vector<32x33xf32>
    %cst_171 = arith.constant dense<0.000000e+00> : vector<8x33xf32>
    %163 = tpu.matmul %152, %162, %cst_171 {dimension_numbers = #tpu.dot_dimension_numbers<[1], [0], [0], [1], [0, 0, 1, 1], [], []>} : vector<8x32xf32>, vector<32x33xf32>, vector<8x33xf32> -> vector<8x33xf32>
    %c0_172 = arith.constant 0 : index
    %c0_173 = arith.constant 0 : index
    %164 = vector.load %arg8[%c0_172, %c0_173] : memref<33x17xf32, #tpu.memory_space<vmem>>, vector<33x17xf32>
    %cst_174 = arith.constant dense<0.000000e+00> : vector<8x17xf32>
    %165 = tpu.matmul %163, %164, %cst_174 {dimension_numbers = #tpu.dot_dimension_numbers<[1], [0], [0], [1], [0, 0, 1, 1], [], []>} : vector<8x33xf32>, vector<33x17xf32>, vector<8x17xf32> -> vector<8x17xf32>
    %166 = vector.broadcast %153 : vector<8x1xf32> to vector<8x17xf32>
    %167 = arith.addf %165, %166 : vector<8x17xf32>
    %cst_175 = arith.constant 0.000000e+00 : f32
    %168 = vector.broadcast %cst_175 : f32 to vector<8x17xf32>
    %169 = arith.cmpf ogt, %167, %168 : vector<8x17xf32>
    %cst_176 = arith.constant 0.000000e+00 : f32
    %170 = vector.broadcast %cst_176 : f32 to vector<8x17xf32>
    %171 = arith.minimumf %167, %170 : vector<8x17xf32>
    %172 = math.exp %171 : vector<8x17xf32>
    %cst_177 = arith.constant 1.000000e+00 : f32
    %173 = vector.broadcast %cst_177 : f32 to vector<8x17xf32>
    %174 = arith.subf %172, %173 : vector<8x17xf32>
    %175 = arith.select %169, %167, %174 : vector<8x17xi1>, vector<8x17xf32>
    %c0_178 = arith.constant 0 : index
    %c0_179 = arith.constant 0 : index
    %c0_180 = arith.constant 0 : index
    %176 = vector.load %arg9[%c0_178, %c0_179, %c0_180] : memref<1x8x17xf32, #tpu.memory_space<vmem>>, vector<1x8x17xf32>
    %177 = vector.shape_cast %176 : vector<1x8x17xf32> to vector<8x17xf32>
    %178 = vector.shape_cast %175 : vector<8x17xf32> to vector<1x8x17xf32>
    tpu.vector_store %arg9[%c0_178, %c0_179, %c0_180], %178 {strides = array<i32>} : memref<1x8x17xf32, #tpu.memory_space<vmem>>, vector<1x8x17xf32>,
    return
  }
  func.func @transform_0(%arg0: i32) -> (i32, i32, i32) {
    %c0_i32 = arith.constant 0 : i32
    %c0_i32_0 = arith.constant 0 : i32
    %c0_i32_1 = arith.constant 0 : i32
    return %arg0, %c0_i32, %c0_i32_0 : i32, i32, i32
  }
  func.func @transform_1(%arg0: i32) -> (i32, i32, i32) {
    %c0_i32 = arith.constant 0 : i32
    %c0_i32_0 = arith.constant 0 : i32
    %c0_i32_1 = arith.constant 0 : i32
    %c0_i32_2 = arith.constant 0 : i32
    return %c0_i32, %c0_i32_0, %c0_i32_1 : i32, i32, i32
  }
  func.func @transform_2(%arg0: i32) -> (i32, i32, i32) {
    %c0_i32 = arith.constant 0 : i32
    %c0_i32_0 = arith.constant 0 : i32
    %c0_i32_1 = arith.constant 0 : i32
    %c0_i32_2 = arith.constant 0 : i32
    return %c0_i32, %c0_i32_0, %c0_i32_1 : i32, i32, i32
  }
  func.func @transform_3(%arg0: i32) -> (i32, i32, i32) {
    %c0_i32 = arith.constant 0 : i32
    %c0_i32_0 = arith.constant 0 : i32
    %c0_i32_1 = arith.constant 0 : i32
    %c0_i32_2 = arith.constant 0 : i32
    return %c0_i32, %c0_i32_0, %c0_i32_1 : i32, i32, i32
  }
  func.func @transform_4(%arg0: i32) -> (i32, i32, i32) {
    %c0_i32 = arith.constant 0 : i32
    %c0_i32_0 = arith.constant 0 : i32
    %c0_i32_1 = arith.constant 0 : i32
    %c0_i32_2 = arith.constant 0 : i32
    return %c0_i32, %c0_i32_0, %c0_i32_1 : i32, i32, i32
  }
  func.func @transform_5(%arg0: i32) -> (i32, i32) {
    %c0_i32 = arith.constant 0 : i32
    %c0_i32_0 = arith.constant 0 : i32
    %c0_i32_1 = arith.constant 0 : i32
    return %c0_i32, %c0_i32_0 : i32, i32
  }
  func.func @transform_6(%arg0: i32) -> (i32, i32) {
    %c0_i32 = arith.constant 0 : i32
    %c0_i32_0 = arith.constant 0 : i32
    %c0_i32_1 = arith.constant 0 : i32
    return %c0_i32, %c0_i32_0 : i32, i32
  }
  func.func @transform_7(%arg0: i32) -> (i32, i32) {
    %c0_i32 = arith.constant 0 : i32
    %c0_i32_0 = arith.constant 0 : i32
    %c0_i32_1 = arith.constant 0 : i32
    return %c0_i32, %c0_i32_0 : i32, i32
  }
  func.func @transform_8(%arg0: i32) -> (i32, i32, i32) {
    %c0_i32 = arith.constant 0 : i32
    %c0_i32_0 = arith.constant 0 : i32
    %c0_i32_1 = arith.constant 0 : i32
    return %arg0, %c0_i32, %c0_i32_0 : i32, i32, i32
  }
}

</mosaic_0001>

<bundles_post_ra>
// kernel: tpu_custom_call.1
= control target key start
LH: loop header
LB: loop body
LE: loop exit
PB: predicated region body
PF: predicated region fallthrough
CT: control target
= control target key end

     0   :  { %13 = vsyncpa [#allocation6], 0  ;;  %s1373_s0 = inlined_call_operand.vmem [shape: f32[2,4,32], index: 0, kind: input, shape index: {}]   ;;  %s1374_s1 = inlined_call_operand.vmem [shape: f32[3,4,56], index: 1, kind: input, shape index: {}]   ;;  %s1375_s2 = inlined_call_operand.vmem [shape: f32[3,4,1], index: 2, kind: input, shape index: {}]   ;;  %s1376_s3 = inlined_call_operand.vmem [shape: f32[3,4,4], index: 3, kind: input, shape index: {}]   ;;  %s1377_s4 = inlined_call_operand.vmem [shape: f32[3,4,1], index: 4, kind: input, shape index: {}]   ;;  %s1378_s5 = inlined_call_operand.vmem [shape: f32[8,32], index: 5, kind: input, shape index: {}]   ;;  %s1379_s6 = inlined_call_operand.vmem [shape: f32[8,1], index: 6, kind: input, shape index: {}]   ;;  %s1380_s7 = inlined_call_operand.vmem [shape: f32[33,17], index: 7, kind: input, shape index: {}]   ;;  %s1381_s8 = inlined_call_operand.hbm [shape: f32[2,8,17], index: 8, kind: output, shape index: {}]  }
   0x1   :  { %15 = vsyncpa [#allocation6 + $0x1], 0  ;;  %s1133_s27 = smov 0   ;;  %s1135_s28 = smov 0  }
   0x2   :  { %s1137_s29 = smov 0   ;;  %s1139_s30 = smov 0  }
   0x3 LB: > { %s1154_s9 = sadd.s32 4294967295, %s1069_s30   ;;  %s897_s10 = sadd.s32 4294967294, %s1069_s30   ;;  %s1069_s30 = sphi %s1139_s30, %s1387_s30   ;;  %s1065_s29 = sphi %s1137_s29, %s1386_s29   ;;  %s1061_s28 = sphi %s1135_s28, %s1385_s28   ;;  %s1057_s27 = sphi %s1133_s27, %s1384_s27  }
   0x4   : > { %s1158_s11 = sadd.s32 1, %s1069_s30   ;;  %s201_s12 = sadd.s32 1, %s1065_s29 }
   0x5   : > { %s198_s13 = ssub.s32 %s1069_s30, %s1158_s11  ;;  %p211_p0 = scmp.ne.s32.totalorder %s1065_s29, %s1061_s28 }
   0x6   : > { %p199_p1 = scmp.eq.s32.totalorder %s198_s13, 0  ;;  %p212_p2 = scmp.eq.s32.totalorder %s1154_s9, 1 }
   0x7   : > { %p217_p3 = scmp.ne.s32.totalorder %s1061_s28, %s1057_s27  ;;  %p218_p4 = scmp.eq.s32.totalorder %s897_s10, 1 }
   0x8   : > { %s1169_s14 = scalar_select %p199_p1, %s1065_s29, %s201_s12  }
   0x9   : > { %p1171_p5 = por %p212_p2, %p211_p0  ;;  %p1175_p6 = por %p218_p4, %p217_p3 }
   0xa   : > { %p900_p7 = scmp.ge.s32.totalorder %s1069_s30, 1  ;;  %p264_p8 = scmp.lt.s32.totalorder %s1069_s30, 3 }
   0xc   : > { %p265_p9 = pnand %p900_p7, %p264_p8 }
   0xd   : > { %p297_p10 = scmp.lt.s32.totalorder (!%p265_p9), %s1154_s9, 1  ;;  %s1072_s22 = smov (!%p265_p9), 27  }
   0xe   : > { %268 = sbr.rel (%p265_p9) target bundleno = 2220 (0x8ac), region = 52  ;;  %s1073_s23 = smov (!%p265_p9), 98  }
   0xf   : > { %s1074_s24 = smov (!%p265_p9), 99   ;;  %s1075_s25 = smov (!%p265_p9), 101  }
  0x10   : > { %s1076_s26 = smov (!%p265_p9), 100   ;;  %s1077_s10 = smov (!%p265_p9), 103  }
  0x11   : > { %s1078_s12 = smov (!%p265_p9), 102   ;;  %s1079_s13 = smov (!%p265_p9), 104  }
  0x12   : > { %s1081_s19 = smov (!%p265_p9), 92   ;;  %s1082_s20 = smov (!%p265_p9), 95  }
  0x13   : > { %vm301_vm0 = vcmask 216064   ;;  %vm303_vm1 = vcmask 699864   ;;  %v1071_v0 = vmov 0.0   ;;  %s298_s17 = scalar_select %p297_p10, %s1154_s9, 1  ;;  %vm305_vm2 = vcmask 261120  }
  0x14   : > { %302 = vst.msk [vmem:[#allocation2] sm:$0xf] %vm301_vm0, %v1071_v0  ;;  %vm323_vm3 = vcmask 478424   ;;  %vm330_vm4 = vcmask 257024   ;;  %v376_v12 = vld [vmem:[%s1375_s2] sm:$0xf] }
  0x15   : > { %304 = vst.msk [vmem:[#allocation2] sm:$0xf] %vm303_vm1, %v1071_v0  ;;  %s902_s18 = sshll.u32 %s298_s17, 2  ;;  %v1080_v13 = vmov 0   ;;  %v368_v25 = vld [vmem:[%s1374_s1] sm:$0xf] }
  0x16   : > { %s300_s21 = scalar_lea.vmem %s1373_s0, %s902_s18  ;;  %309 = vst.msk [vmem:[#allocation3 + $0x18] sm:$0xff] %vm305_vm2, %v1071_v0  ;;  %990 = vset.pattern.permute.xlu2 %v1080_v13  ;;  %991 = vset.pattern.permute.xlu0 %v1080_v13  ;;  %vm382_vm5 = vcmask 457728   ;;  %v413_v27 = vld [vmem:[%s1377_s4] sm:$0xf]  ;;  %vm423_vm6 = vcmask 1043456   ;;  %vm419_vm8 = vcmask 31744  }
  0x17   : > { %v1188_v1 = vld [vmem:[%s300_s21] sm:$0xf]  ;;  %306 = vst.msk [vmem:[#allocation3] sm:$0xff] %vm305_vm2, %v1071_v0  ;;  %992 = vset.pattern.permute.xlu1 %v1080_v13  ;;  %s1083_s21 = smov 110   ;;  %v913_v54 = vld [vmem:[%s1377_s4 + $0x4] sm:$0xf] }
  0x18   : > { %320 = vrot.lane.b32.xlu0 %v1188_v1, %s1072_s22  ;;  %307 = vst.msk [vmem:[#allocation3 + $0x8] sm:$0xff] %vm305_vm2, %v1071_v0  ;;  %v412_v35 = vld [vmem:[%s1376_s3] sm:$0xf]  ;;  %v909_v58 = vld [vmem:[%s1375_s2 + $0x4] sm:$0xf]  ;;  %vm313_vm14 = vcmask 269312  }
  0x19   : > { %308 = vst.msk [vmem:[#allocation3 + $0x10] sm:$0xff] %vm305_vm2, %v1071_v0  ;;  %vm730_vm15 = vcmask 265216   ;;  %vm790_vm0 = vcmask 1040384   ;;  %s931_s18 = sshll.u32 %s1154_s9, 3  ;;  %vm820_vm1 = vcmask 138240  }
  0x1a   : > { %310 = vst.msk [vmem:[#allocation3 + $0x20] sm:$0xff] %vm305_vm2, %v1071_v0 }
  0x1b   : > { %311 = vst.msk [vmem:[#allocation3 + $0x28] sm:$0xff] %vm305_vm2, %v1071_v0 }
  0x1c   : > { %312 = vst.msk [vmem:[#allocation3 + $0x30] sm:$0xff] %vm305_vm2, %v1071_v0 }
  0x1d   : > { %316 = vst.msk [vmem:[#allocation4 + $0x10] sm:$0xff] %vm313_vm14, %v1071_v0 }
  0x1e   : > { %314 = vst.msk [vmem:[#allocation4] sm:$0xff] %vm313_vm14, %v1071_v0 }
  0x1f   : > { %315 = vst.msk [vmem:[#allocation4 + $0x8] sm:$0xff] %vm313_vm14, %v1071_v0 }
  0x20   : > { %317 = vst.msk [vmem:[#allocation4 + $0x18] sm:$0xff] %vm313_vm14, %v1071_v0 }
  0x8a   : > { %v321_v2 = vpop.permute.xlu0 %320 }
  0x8b   : > { %324 = vst.msk [vmem:[#allocation2] sm:$0xf] %vm323_vm3, %v321_v2 }
  0x92   : > { %v362_v3 = vld [vmem:[#allocation2] sm:$0xf] }
  0x93   : > { %v356_v4 = vld [vmem:[#allocation2] sm:$0xf]  ;;  %364 = vrot.lane.b32.xlu0 %v362_v3, %s1073_s23 }
  0x94   : > { %v344_v5 = vld [vmem:[#allocation2] sm:$0xf]  ;;  %358 = vrot.lane.b32.xlu1 %v356_v4, %s1074_s24  ;;  %s1084_s24 = smov 107  }
  0x95   : > { %346 = vrot.lane.b32.xlu2 %v344_v5, %s1075_s25  ;;  %v350_v6 = vld [vmem:[#allocation2] sm:$0xf] }
  0x96   : > { %v332_v7 = vld [vmem:[#allocation2] sm:$0xf] }
  0x97   : > { %v338_v8 = vld [vmem:[#allocation2] sm:$0xf] }
  0x98   : > { %v325_v9 = vld [vmem:[#allocation2] sm:$0xf] }
  0x9b   : > { %334 = vrot.lane.b32.xlu0 %v332_v7, %s1077_s10 }
  0x9c   : > { %352 = vrot.lane.b32.xlu1 %v350_v6, %s1076_s26  ;;  %v908_v6 = vld [vmem:[%s1374_s1 + $0x4] sm:$0xf] }
  0x9d   : > { %340 = vrot.lane.b32.xlu2 %v338_v8, %s1078_s12 }
  0xa3   : > { %416 = vperm.xlu0 %991, %v413_v27  }
  0xa4   : > { %327 = vrot.lane.b32.xlu1 %v325_v9, %s1079_s13 }
  0xa5   : > { %379 = vperm.xlu2 %990, %v376_v12  }
  0xef   : > { %v347_v10 = vpop.permute.xlu2 %346 }
  0xf0   : > { %349 = vst.msk [vmem:[#allocation3 + $0x18] sm:$0xf] %vm330_vm4, %v347_v10 }
  0xf7   : > { %v341_v11 = vpop.permute.xlu2 %340  ;;  %v372_v22 = vld [vmem:[#allocation3 + $0x18] sm:$0xff] }
  0xf8   : > { %343 = vst.msk [vmem:[#allocation3 + $0x10] sm:$0xf] %vm330_vm4, %v341_v11 }
  0xff   : > { %v371_v23 = vld [vmem:[#allocation3 + $0x10] sm:$0xff]  ;;  %v380_v28 = vpop.permute.xlu2 %379 }
 0x105   : > { %v365_v14 = vpop.permute.xlu0 %364 }
 0x106   : > { %v359_v15 = vpop.permute.xlu1 %358  ;;  %367 = vst.msk [vmem:[#allocation3 + $0x30] sm:$0xf] %vm330_vm4, %v365_v14 }
 0x107   : > { %361 = vst.msk [vmem:[#allocation3 + $0x28] sm:$0xf] %vm330_vm4, %v359_v15  ;;  %v912_v15 = vld [vmem:[%s1376_s3 + $0x4] sm:$0xf] }
 0x10d   : > { %v335_v17 = vpop.permute.xlu0 %334  ;;  %v375_v18 = vld [vmem:[#allocation3 + $0x30] sm:$0xff] }
 0x10e   : > { %v353_v16 = vpop.permute.xlu1 %352  ;;  %395 = vmatpush.msra.mxu0 %v375_v18  ;;  %337 = vst.msk [vmem:[#allocation3 + $0x8] sm:$0xf] %vm330_vm4, %v335_v17  ;;  %v374_v19 = vld [vmem:[#allocation3 + $0x28] sm:$0xff] }
 0x10f   : > { %355 = vst.msk [vmem:[#allocation3 + $0x20] sm:$0xf] %vm330_vm4, %v353_v16 }
 0x110   : > { %396 = vmatpush.msra.mxu0 %v374_v19 }
 0x115   : > { %v370_v24 = vld [vmem:[#allocation3 + $0x8] sm:$0xff]  ;;  %v417_v37 = vpop.permute.xlu0 %416 }
 0x116   : > { %v328_v20 = vpop.permute.xlu1 %327  ;;  %v373_v21 = vld [vmem:[#allocation3 + $0x20] sm:$0xff] }
 0x117   : > { %331 = vst.msk [vmem:[#allocation3] sm:$0xf] %vm330_vm4, %v328_v20  ;;  %397 = vmatpush.msra.mxu0 %v373_v21 }
 0x119   : > { %398 = vmatpush.msra.mxu0 %v372_v22 }
 0x11b   : > { %399 = vmatpush.msra.mxu0 %v371_v23 }
 0x11d   : > { %400 = vmatpush.msra.mxu0 %v370_v24 }
 0x11e   : > { %v369_v26 = vld [vmem:[#allocation3] sm:$0xff] }
 0x11f   : > { %401 = vmatpush.msra.mxu0 %v369_v26 }
 0x120   : > { %903 = vmatmul.msk.f32.vlgmr.msra.gmra.mxu0 %vm382_vm5, %v368_v25 }
 0x19d   : > { %v403_v29 = vpop.f32.mrf.mxu0 }
 0x19e   : > { %v404_v30 = vadd.f32 %v403_v29, %v380_v28 }
 0x1a0   : > { %v407_v31 = vmin.f32 %v404_v30, 0.0  ;;  %vm406_vm7 = vcmp.gt.f32.partialorder %v404_v30, 0.0 }
 0x1a2   : > { %v408_v32 = vmul.f32 1.442695, %v407_v31 }
 0x1a4   : > { %993 = vpow2.f32 %v408_v32 }
 0x1aa   : > { %v994_v33 = vpop.eup %993 }
 0x1ab   : > { %v904_v34 = vadd.f32 -1.0, %v994_v33 }
 0x1ad   : > { %v411_v36 = vsel %vm406_vm7, %v404_v30, %v904_v34  ;;  %v918_v34 = vld [vmem:[%s1375_s2 + $0x8] sm:$0xf] }
 0x1ae   : > { %905 = vmatpush.msk.msra.mxu1 %vm423_vm6, %v411_v36 }
 0x1af   : > { %906 = vmatmul.msk.f32.vlgmr.msra.gmra.mxu1 %vm419_vm8, %v412_v35  ;;  %v922_v35 = vld [vmem:[%s1377_s4 + $0x8] sm:$0xf] }
 0x22c   : > { %v444_v38 = vpop.f32.mrf.mxu1 }
 0x22d   : > { %v445_v39 = vadd.f32 %v444_v38, %v417_v37 }
 0x22f   : > { %v447_v40 = vadd.f32 %v445_v39, %v1188_v1 }
 0x231   : > { %v449_v41 = vmin.f32 %v447_v40, 0.0  ;;  %vm448_vm9 = vcmp.gt.f32.partialorder %v447_v40, 0.0 }
 0x233   : > { %v450_v42 = vmul.f32 1.442695, %v449_v41 }
 0x235   : > { %995 = vpow2.f32 %v450_v42 }
 0x23b   : > { %v996_v43 = vpop.eup %995 }
 0x23c   : > { %v907_v44 = vadd.f32 -1.0, %v996_v43 }
 0x23e   : > { %v1236_v45 = vsel %vm448_vm9, %v447_v40, %v907_v44 }
 0x23f   : > { %455 = vrot.lane.b32.xlu1 %v1236_v45, %s1072_s22 }
 0x2b1   : > { %v456_v46 = vpop.permute.xlu1 %455 }
 0x2b2   : > { %458 = vst.msk [vmem:[#allocation2] sm:$0xf] %vm323_vm3, %v456_v46 }
 0x2b9   : > { %v495_v47 = vld [vmem:[#allocation2] sm:$0xf] }
 0x2ba   : > { %v489_v48 = vld [vmem:[#allocation2] sm:$0xf]  ;;  %497 = vrot.lane.b32.xlu2 %v495_v47, %s1081_s19 }
 0x2bb   : > { %v477_v49 = vld [vmem:[#allocation2] sm:$0xf]  ;;  %491 = vrot.lane.b32.xlu1 %v489_v48, %s1082_s20  ;;  %s1087_s20 = smov 119   ;;  %v917_v48 = vld [vmem:[%s1374_s1 + $0x8] sm:$0xf] }
 0x2bc   : > { %479 = vrot.lane.b32.xlu0 %v477_v49, %s1075_s25  ;;  %v483_v50 = vld [vmem:[#allocation2] sm:$0xf] }
 0x2bd   : > { %v471_v51 = vld [vmem:[#allocation2] sm:$0xf] }
 0x2be   : > { %v459_v52 = vld [vmem:[#allocation2] sm:$0xf] }
 0x2bf   : > { %v465_v53 = vld [vmem:[#allocation2] sm:$0xf] }
 0x2c2   : > { %485 = vrot.lane.b32.xlu2 %v483_v50, %s1073_s23  ;;  %s1085_s23 = smov 74  }
 0x2c3   : > { %473 = vrot.lane.b32.xlu1 %v471_v51, %s1079_s13  ;;  %s1086_s13 = smov 83  }
 0x2c4   : > { %461 = vrot.lane.b32.xlu0 %v459_v52, %s1083_s21 }
 0x2ca   : > { %467 = vrot.lane.b32.xlu2 %v465_v53, %s1084_s24  ;;  %s294_s24 = sand.u32 1, %s1061_s28  }
 0x2cb   : > { %514 = vperm.xlu1 %992, %v909_v58   ;;  %s901_s17 = sshll.u32 %s294_s24, 3 }
 0x2d2   : > { %552 = vperm.xlu2 %990, %v913_v54  }
 0x314   : > { %v498_v55 = vpop.permute.xlu2 %497 }
 0x315   : > { %500 = vst.msk [vmem:[#allocation3 + $0x30] sm:$0xf] %vm330_vm4, %v498_v55 }
 0x31c   : > { %v486_v56 = vpop.permute.xlu2 %485  ;;  %v509_v57 = vld [vmem:[#allocation3 + $0x30] sm:$0xff] }
 0x31d   : > { %488 = vst.msk [vmem:[#allocation3 + $0x20] sm:$0xf] %vm330_vm4, %v486_v56  ;;  %529 = vmatpush.msra.mxu2 %v509_v57  ;;  %v921_v57 = vld [vmem:[%s1376_s3 + $0x8] sm:$0xf] }
 0x324   : > { %v468_v59 = vpop.permute.xlu2 %467  ;;  %v507_v2 = vld [vmem:[#allocation3 + $0x20] sm:$0xff] }
 0x325   : > { %470 = vst.msk [vmem:[#allocation3 + $0x8] sm:$0xf] %vm330_vm4, %v468_v59 }
 0x32c   : > { %v504_v5 = vld [vmem:[#allocation3 + $0x8] sm:$0xff]  ;;  %v553_v17 = vpop.permute.xlu2 %552 }
 0x32d   : > { %v492_v60 = vpop.permute.xlu1 %491 }
 0x32e   : > { %494 = vst.msk [vmem:[#allocation3 + $0x28] sm:$0xf] %vm330_vm4, %v492_v60  ;;  %v480_v61 = vpop.permute.xlu0 %479 }
 0x32f   : > { %482 = vst.msk [vmem:[#allocation3 + $0x18] sm:$0xf] %vm330_vm4, %v480_v61 }
 0x335   : > { %v474_v62 = vpop.permute.xlu1 %473  ;;  %v508_v63 = vld [vmem:[#allocation3 + $0x28] sm:$0xff] }
 0x336   : > { %476 = vst.msk [vmem:[#allocation3 + $0x10] sm:$0xf] %vm330_vm4, %v474_v62  ;;  %v462_v1 = vpop.permute.xlu0 %461  ;;  %530 = vmatpush.msra.mxu2 %v508_v63  ;;  %v506_v3 = vld [vmem:[#allocation3 + $0x18] sm:$0xff] }
 0x337   : > { %464 = vst.msk [vmem:[#allocation3] sm:$0xf] %vm330_vm4, %v462_v1 }
 0x338   : > { %531 = vmatpush.msra.mxu2 %v507_v2 }
 0x33a   : > { %532 = vmatpush.msra.mxu2 %v506_v3 }
 0x33d   : > { %v505_v4 = vld [vmem:[#allocation3 + $0x10] sm:$0xff]  ;;  %v515_v8 = vpop.permute.xlu1 %514 }
 0x33e   : > { %533 = vmatpush.msra.mxu2 %v505_v4  ;;  %v503_v7 = vld [vmem:[#allocation3] sm:$0xff] }
 0x340   : > { %534 = vmatpush.msra.mxu2 %v504_v5 }
 0x342   : > { %535 = vmatpush.msra.mxu2 %v503_v7 }
 0x343   : > { %910 = vmatmul.msk.f32.vlgmr.msra.gmra.mxu2 %vm382_vm5, %v908_v6 }
 0x3c6   : > { %v537_v9 = vpop.f32.mrf.mxu2 }
 0x3c7   : > { %v538_v10 = vadd.f32 %v537_v9, %v515_v8  ;;  %v724_v9 = vld [vmem:[%s1379_s6] sm:$0xff] }
 0x3c9   : > { %v541_v11 = vmin.f32 %v538_v10, 0.0  ;;  %vm540_vm10 = vcmp.gt.f32.partialorder %v538_v10, 0.0 }
 0x3cb   : > { %v542_v12 = vmul.f32 1.442695, %v541_v11  ;;  %v781_v11 = vld [vmem:[%s1380_s7 + $0x20] sm:$0x1] }
 0x3cc   : > { %927 = vmatpush.msk.msrb.mxu0 %vm790_vm0, %v781_v11 }
 0x3cd   : > { %997 = vpow2.f32 %v542_v12  ;;  %v780_v12 = vld [vmem:[%s1380_s7 + $0x18] sm:$0xff] }
 0x3ce   : > { %806 = vmatpush.msrb.mxu0 %v780_v12 }
 0x3d3   : > { %v998_v13 = vpop.eup %997 }
 0x3d4   : > { %v911_v14 = vadd.f32 -1.0, %v998_v13  ;;  %v779_v13 = vld [vmem:[%s1380_s7 + $0x10] sm:$0xff] }
 0x3d5   : > { %807 = vmatpush.msrb.mxu0 %v779_v13 }
 0x3d6   : > { %v545_v16 = vsel %vm540_vm10, %v538_v10, %v911_v14  ;;  %v778_v14 = vld [vmem:[%s1380_s7 + $0x8] sm:$0xff] }
 0x3d7   : > { %914 = vmatpush.msk.msra.mxu3 %vm423_vm6, %v545_v16  ;;  %808 = vmatpush.msrb.mxu0 %v778_v14 }
 0x3d8   : > { %915 = vmatmul.msk.f32.vlgmr.msra.gmra.mxu3 %vm419_vm8, %v912_v15 }
 0x45b   : > { %v578_v18 = vpop.f32.mrf.mxu3 }
 0x45c   : > { %v579_v19 = vadd.f32 %v578_v18, %v553_v17 }
 0x45e   : > { %v581_v20 = vadd.f32 %v579_v19, %v1236_v45 }
 0x460   : > { %v583_v21 = vmin.f32 %v581_v20, 0.0  ;;  %vm582_vm11 = vcmp.gt.f32.partialorder %v581_v20, 0.0 }
 0x462   : > { %v584_v22 = vmul.f32 1.442695, %v583_v21  ;;  %v723_v21 = vld [vmem:[%s1378_s5] sm:$0xff] }
 0x464   : > { %999 = vpow2.f32 %v584_v22 }
 0x46a   : > { %v1000_v23 = vpop.eup %999 }
 0x46b   : > { %v916_v24 = vadd.f32 -1.0, %v1000_v23  ;;  %v777_v23 = vld [vmem:[%s1380_s7] sm:$0xff] }
 0x46c   : > { %809 = vmatpush.msrb.mxu0 %v777_v23 }
 0x46d   : > { %v1269_v25 = vsel %vm582_vm11, %v581_v20, %v916_v24 }
 0x46e   : > { %589 = vrot.lane.b32.xlu0 %v1269_v25, %s1072_s22 }
 0x4e0   : > { %v590_v26 = vpop.permute.xlu0 %589 }
 0x4e1   : > { %592 = vst.msk [vmem:[#allocation2] sm:$0xf] %vm323_vm3, %v590_v26 }
 0x4e8   : > { %v625_v27 = vld [vmem:[#allocation2] sm:$0xf] }
 0x4e9   : > { %v619_v28 = vld [vmem:[#allocation2] sm:$0xf]  ;;  %627 = vrot.lane.b32.xlu1 %v625_v27, %s1085_s23  ;;  %s296_s23 = scalar_lea.vmem [#allocation5], %s901_s17  ;;  %s1027_s17 = scalar_lea.hbm %s1381_s8, 16 }
 0x4ea   : > { %v613_v29 = vld [vmem:[#allocation2] sm:$0xf]  ;;  %621 = vrot.lane.b32.xlu2 %v619_v28, %s1086_s13 }
 0x4eb   : > { %615 = vrot.lane.b32.xlu0 %v613_v29, %s1081_s19  ;;  %v593_v30 = vld [vmem:[#allocation2] sm:$0xf] }
 0x4ec   : > { %594 = vst.msk [vmem:[#allocation3] sm:$0xf] %vm330_vm4, %v593_v30  ;;  %v607_v31 = vld [vmem:[#allocation2] sm:$0xf] }
 0x4ed   : > { %v601_v32 = vld [vmem:[#allocation2] sm:$0xf] }
 0x4ee   : > { %v595_v33 = vld [vmem:[#allocation2] sm:$0xf] }
 0x4f1   : > { %609 = vrot.lane.b32.xlu1 %v607_v31, %s1075_s25 }
 0x4f2   : > { %603 = vrot.lane.b32.xlu2 %v601_v32, %s1083_s21  ;;  %s823_s21 = scalar_lea.sflag [#allocation6], %s294_s24 }
 0x4f3   : > { %597 = vrot.lane.b32.xlu0 %v595_v33, %s1087_s20  ;;  %v633_v49 = vld [vmem:[#allocation3] sm:$0xff] }
 0x4f9   : > { %644 = vperm.xlu1 %992, %v918_v34  }
 0x4fa   : > { %682 = vperm.xlu2 %990, %v922_v35  }
 0x544   : > { %v622_v36 = vpop.permute.xlu2 %621 }
 0x545   : > { %624 = vst.msk [vmem:[#allocation3 + $0x28] sm:$0xf] %vm330_vm4, %v622_v36 }
 0x54c   : > { %v604_v37 = vpop.permute.xlu2 %603  ;;  %v638_v43 = vld [vmem:[#allocation3 + $0x28] sm:$0xff] }
 0x54d   : > { %606 = vst.msk [vmem:[#allocation3 + $0x10] sm:$0xf] %vm330_vm4, %v604_v37 }
 0x554   : > { %v635_v46 = vld [vmem:[#allocation3 + $0x10] sm:$0xff]  ;;  %v683_v59 = vpop.permute.xlu2 %682 }
 0x55b   : > { %v628_v38 = vpop.permute.xlu1 %627 }
 0x55c   : > { %630 = vst.msk [vmem:[#allocation3 + $0x30] sm:$0xf] %vm330_vm4, %v628_v38 }
 0x55d   : > { %v616_v39 = vpop.permute.xlu0 %615 }
 0x55e   : > { %618 = vst.msk [vmem:[#allocation3 + $0x20] sm:$0xf] %vm330_vm4, %v616_v39 }
 0x563   : > { %v610_v40 = vpop.permute.xlu1 %609  ;;  %v639_v41 = vld [vmem:[#allocation3 + $0x30] sm:$0xff] }
 0x564   : > { %612 = vst.msk [vmem:[#allocation3 + $0x18] sm:$0xf] %vm330_vm4, %v610_v40  ;;  %659 = vmatpush.msrb.mxu1 %v639_v41 }
 0x565   : > { %v598_v42 = vpop.permute.xlu0 %597  ;;  %v637_v44 = vld [vmem:[#allocation3 + $0x20] sm:$0xff] }
 0x566   : > { %600 = vst.msk [vmem:[#allocation3 + $0x8] sm:$0xf] %vm330_vm4, %v598_v42  ;;  %660 = vmatpush.msrb.mxu1 %v638_v43 }
 0x568   : > { %661 = vmatpush.msrb.mxu1 %v637_v44 }
 0x56b   : > { %v636_v45 = vld [vmem:[#allocation3 + $0x18] sm:$0xff]  ;;  %v645_v50 = vpop.permute.xlu1 %644 }
 0x56c   : > { %662 = vmatpush.msrb.mxu1 %v636_v45 }
 0x56d   : > { %v634_v47 = vld [vmem:[#allocation3 + $0x8] sm:$0xff] }
 0x56e   : > { %663 = vmatpush.msrb.mxu1 %v635_v46 }
 0x570   : > { %664 = vmatpush.msrb.mxu1 %v634_v47 }
 0x572   : > { %665 = vmatpush.msrb.mxu1 %v633_v49 }
 0x573   : > { %919 = vmatmul.msk.f32.vlgmr.msrb.gmra.mxu1 %vm382_vm5, %v917_v48 }
 0x5f0   : > { %v667_v51 = vpop.f32.mrf.mxu1 }
 0x5f1   : > { %v668_v52 = vadd.f32 %v667_v51, %v645_v50 }
 0x5f3   : > { %v671_v53 = vmin.f32 %v668_v52, 0.0  ;;  %vm670_vm12 = vcmp.gt.f32.partialorder %v668_v52, 0.0 }
 0x5f5   : > { %v672_v54 = vmul.f32 1.442695, %v671_v53 }
 0x5f7   : > { %1001 = vpow2.f32 %v672_v54 }
 0x5fd   : > { %v1002_v55 = vpop.eup %1001 }
 0x5fe   : > { %v920_v56 = vadd.f32 -1.0, %v1002_v55 }
 0x600   : > { %v675_v58 = vsel %vm670_vm12, %v668_v52, %v920_v56 }
 0x601   : > { %923 = vmatpush.msk.msrb.mxu3 %vm423_vm6, %v675_v58 }
 0x602   : > { %924 = vmatmul.msk.f32.vlgmr.msrb.gmra.mxu3 %vm419_vm8, %v921_v57 }
 0x685   : > { %v708_v60 = vpop.f32.mrf.mxu3 }
 0x686   : > { %v709_v61 = vadd.f32 %v708_v60, %v683_v59 }
 0x688   : > { %v711_v62 = vadd.f32 %v709_v61, %v1269_v25 }
 0x68a   : > { %v713_v63 = vmin.f32 %v711_v62, 0.0  ;;  %vm712_vm13 = vcmp.gt.f32.partialorder %v711_v62, 0.0 }
 0x68c   : > { %v714_v1 = vmul.f32 1.442695, %v713_v63 }
 0x68e   : > { %1003 = vpow2.f32 %v714_v1 }
 0x694   : > { %v1004_v2 = vpop.eup %1003 }
 0x695   : > { %v925_v3 = vadd.f32 -1.0, %v1004_v2 }
 0x697   : > { %v717_v4 = vsel %vm712_vm13, %v711_v62, %v925_v3 }
 0x698   : > { %719 = vrot.lane.b32.xlu0 %v717_v4, %s1072_s22 }
 0x70a   : > { %v720_v5 = vpop.permute.xlu0 %719 }
 0x70b   : > { %722 = vst.msk [vmem:[#allocation2] sm:$0xf] %vm323_vm3, %v720_v5 }
 0x712   : > { %v744_v6 = vld [vmem:[#allocation2] sm:$0xf] }
 0x713   : > { %v738_v7 = vld [vmem:[#allocation2] sm:$0xf]  ;;  %746 = vrot.lane.b32.xlu1 %v744_v6, %s1076_s26 }
 0x714   : > { %v732_v8 = vld [vmem:[#allocation2] sm:$0xf]  ;;  %740 = vrot.lane.b32.xlu2 %v738_v7, %s1075_s25 }
 0x715   : > { %734 = vrot.lane.b32.xlu0 %v732_v8, %s1078_s12  ;;  %v725_v10 = vld [vmem:[#allocation2] sm:$0xf]  ;;  %s833_s12 = scalar_lea.hbm %s1381_s8, %s931_s18 }
 0x716   : > { %s837_s19 = sshll.u32 %s833_s12, 4  ;;  %s838_s19 = int_to_ptr.hbm [resolvable:$true] %s837_s19 }
 0x717   : > { %s1021_s13 = sshra.s32 %s838_s19, 4  ;;  %s1022_s13 = int_to_ptr.hbm [resolvable:$true] %s1021_s13 }
 0x718   : > { %s1023_s9 = scalar_lea.hbm %s1022_s13, 8  ;;  %p1028_p0 = scmp.lt.s32.totalorder %s1022_s13, %s1381_s8 }
 0x719   : > { %p1024_p11 = scmp.ne.s32.totalorder %s1022_s13, %s1023_s9  ;;  %p1029_p1 = scmp.lt.s32.totalorder %s1027_s17, %s1023_s9 }
 0x71b   : > { %727 = vrot.lane.b32.xlu1 %v725_v10, %s1077_s10  ;;  %s835_s10 = sshll.u32 %s296_s23, 4  ;;  %p1025_p12 = pnand %p1024_p11, %p1171_p5  ;;  %s836_s10 = int_to_ptr.vmem [resolvable:$true] %s835_s10 }
 0x71c   : > { %784 = vperm.xlu2 %990, %v724_v9   ;;  %p1030_p2 = por %p1029_p1, %p1028_p0 }
 0x71d   : > { %p1026_p13 = pneg %p1025_p12 }
 0x71f   : > { %p1031_p3 = pnand %p1030_p2, %p1026_p13 }
 0x76e   : > { %v741_v0 = vpop.permute.xlu2 %740 }
 0x76f   : > { %743 = vst.msk [vmem:[#allocation4 + $0x10] sm:$0xf] %vm730_vm15, %v741_v0 }
 0x776   : > { %v752_v19 = vld [vmem:[#allocation4 + $0x10] sm:$0xff]  ;;  %v785_v25 = vpop.permute.xlu2 %784 }
 0x785   : > { %v747_v15 = vpop.permute.xlu1 %746 }
 0x786   : > { %749 = vst.msk [vmem:[#allocation4 + $0x18] sm:$0xf] %vm730_vm15, %v747_v15 }
 0x787   : > { %v735_v16 = vpop.permute.xlu0 %734 }
 0x788   : > { %737 = vst.msk [vmem:[#allocation4 + $0x8] sm:$0xf] %vm730_vm15, %v735_v16 }
 0x78d   : > { %v728_v17 = vpop.permute.xlu1 %727  ;;  %v753_v18 = vld [vmem:[#allocation4 + $0x18] sm:$0xff] }
 0x78e   : > { %731 = vst.msk [vmem:[#allocation4] sm:$0xf] %vm730_vm15, %v728_v17  ;;  %769 = vmatpush.msra.mxu3 %v753_v18 }
 0x78f   : > { %v751_v20 = vld [vmem:[#allocation4 + $0x8] sm:$0xff] }
 0x790   : > { %770 = vmatpush.msra.mxu3 %v752_v19 }
 0x792   : > { %771 = vmatpush.msra.mxu3 %v751_v20 }
 0x795   : > { %v750_v22 = vld [vmem:[#allocation4] sm:$0xff] }
 0x796   : > { %772 = vmatpush.msra.mxu3 %v750_v22 }
 0x797   : > { %926 = vmatmul.msk.f32.vlgmr.msra.gmra.mxu3 %vm305_vm2, %v723_v21 }
 0x81a   : > { %v774_v24 = vpop.f32.mrf.mxu3 }
 0x81b   : > { %928 = vmatmul.msk.f32.vlgmr.msrb.gmra.mxu0 %vm313_vm14, %v774_v24 }
 0x898   : > { %v811_v26 = vpop.f32.mrf.mxu0 }
 0x899   : > { %v812_v27 = vadd.f32 %v811_v26, %v785_v25 }
 0x89b   : > { %v815_v28 = vmin.f32 %v812_v27, 0.0  ;;  %vm814_vm2 = vcmp.gt.f32.partialorder %v812_v27, 0.0 }
 0x89d   : > { %v816_v29 = vmul.f32 1.442695, %v815_v28 }
 0x89f   : > { %1005 = vpow2.f32 %v816_v29 }
 0x8a5   : > { %v1006_v30 = vpop.eup %1005 }
 0x8a6   : > { %v929_v31 = vadd.f32 -1.0, %v1006_v30 }
 0x8a8   : > { %v819_v32 = vsel %vm814_vm2, %v812_v27, %v929_v31 }
 0x8a9   : > { %821 = vst.msk [vmem:[%s296_s23] sm:$0xff] %vm820_vm1, %v819_v32 }
 0x8aa   : > { %1034 = shalt.err (!%p1031_p3)
}
 0x8ab   : > { %934 = dma.vmem_to_hbm [thread:$0]  (%p1171_p5), %s836_s10, 128, %s838_s19, %s823_s21  }
 0x8ac PF: > { %p940_p4 = scmp.ge.s32.totalorder %s1069_s30, 2  ;;  %s849_s24 = sand.u32 1, %s1057_s27  }
 0x8ad   : > { %s850_s26 = scalar_lea.sflag [#allocation6], %s849_s24 }
 0x8ae   : > { %p937_p7 = pnand %p940_p4, %p1175_p6 }
 0x8b0   : > { %p938_p8 = pneg %p937_p7 }
 0x8b2   : > { %1052 = dma.done.wait (%p938_p8), %s850_s26, 128  }
 0x8b3   : > { %1054 = vsyncadd (%p938_p8), %s850_s26, 4294967168  ;;  %p18_p9 = scmp.ge.s32.totalorder %s1158_s11, 4   ;;  %s1384_s27 = smov %s1061_s28 }
 0x8b4   : > { %s1385_s28 = smov %s1065_s29  ;;  %s1386_s29 = smov %s1169_s14 }
 0x8b5   : > { %s1387_s30 = smov %s1158_s11  ;;  %20 = sbr.rel (!%p18_p9) target bundleno = 3 (0x3), region = 95 }
 0x8ba   :  { %856 = vsyncpa [#allocation6], 1 }
 0x8bb   :  { %858 = vsyncpa [#allocation6 + $0x1], 1 }

</bundles_post_ra>
